<compile_context>
chip_gen: v7x
topology: tpu7x:2x2x1
jax: 0.10.0
libtpu: 0.0.40
codegen_flags: <defaults>
</compile_context>

<pallas_src>
import jax
import jax.numpy as jnp
from jax import lax
from jax.experimental import pallas as pl
from jax.experimental.pallas import tpu as pltpu


_CHUNK = 128  # folded rows per inner-loop step (bounds live f32 intermediates)


def _round_up(x, m):
    return (x + m - 1) // m * m


def _renderer_kernel(x_ref, w1_ref, b1_ref, w2_ref, b2_ref, w3_ref, b3_ref,
                     o_ref):
    """One grid step: (tile, F*in) f32 rows -> (tile, F*out) f32 outputs."""
    # Resident lane-folded weights (bf16) / biases (f32), loaded once per step.
    w1 = w1_ref[...]
    b1 = b1_ref[...]
    w2 = w2_ref[...]
    b2 = b2_ref[...]
    w3 = w3_ref[...]
    b3 = b3_ref[...]

    n_chunks = x_ref.shape[0] // _CHUNK

    def body(c, carry):
        r = pl.multiple_of(c * _CHUNK, _CHUNK)
        # Layer 1: bf16 x (cast in-register) @ bf16 block-diag W1, f32 accum.
        x = x_ref[pl.ds(r, _CHUNK), :].astype(jnp.bfloat16)
        h = jnp.dot(x, w1, preferred_element_type=jnp.float32)
        h = jnp.maximum(h + b1, 0.0)
        # Layer 2: bf16 h @ bf16 block-diag W2, f32 accum.
        h = jnp.dot(h.astype(jnp.bfloat16), w2,
                    preferred_element_type=jnp.float32)
        h = jnp.maximum(h + b2, 0.0)
        # Layer 3: bf16 h @ bf16 staircase W3 -> (chunk, F*out_dim).
        o = jnp.dot(h.astype(jnp.bfloat16), w3,
                    preferred_element_type=jnp.float32)
        o_ref[pl.ds(r, _CHUNK), :] = (o + b3).astype(o_ref.dtype)
        return carry

    lax.fori_loop(0, n_chunks, body, 0, unroll=n_chunks <= 4)


def g_renderer_forward(x, params, *, tile_rows=2048,
                       vmem_limit_bytes=32 * 1024 * 1024):
    """G_Renderer forward. x: (..., in_dim) f32; params W*/b* in (in, out) layout."""
    *lead, in_dim = x.shape
    x2 = x.reshape(-1, in_dim)
    n_rows = x2.shape[0]

    W1, b1 = params["W1"], params["b1"]
    W2, b2 = params["W2"], params["b2"]
    W3, b3 = params["W3"], params["b3"]
    hidden = W1.shape[1]
    out_dim = W3.shape[1]

    # Lane-folding factor: pack `fold` consecutive rows into one 128-lane vreg.
    fold = max(1, 128 // max(in_dim, hidden))

    # Folded weights (tiny arrays, built per call, fused under jit):
    #   W1f/W2f: block-diagonal (fold copies on the diagonal)
    #   W3f    : staircase  (output column group j only sees lane block j)
    eye = jnp.eye(fold, dtype=jnp.float32)
    W1f = jnp.kron(eye, W1.astype(jnp.float32)).astype(jnp.bfloat16)
    W2f = jnp.kron(eye, W2.astype(jnp.float32)).astype(jnp.bfloat16)
    W3f = jnp.kron(eye, W3.astype(jnp.float32)).astype(jnp.bfloat16)
    b1f = jnp.tile(b1.reshape(1, hidden).astype(jnp.float32), (1, fold))
    b2f = jnp.tile(b2.reshape(1, hidden).astype(jnp.float32), (1, fold))
    b3f = jnp.tile(b3.reshape(1, out_dim).astype(jnp.float32), (1, fold))

    # Fold x: (N, in_dim) -> (N/fold, fold*in_dim). Row-major contiguous
    # reshape => free.  No wrapper-side dtype cast of x (done in-register).
    n4 = _round_up(n_rows, fold)
    if n4 != n_rows:                              # ragged tail only (<= fold-1 rows)
        x2 = jnp.pad(x2, ((0, n4 - n_rows), (0, 0)))
    folded_rows = n4 // fold
    x_f = x2.reshape(folded_rows, fold * in_dim)

    # Row tile (folded rows): big blocks to amortize per-step overhead, but
    # keep >= 4 grid steps when possible (2 per TensorCore on v7x).
    tile = max(_CHUNK, _round_up(min(tile_rows, folded_rows), _CHUNK))
    while tile > _CHUNK and pl.cdiv(folded_rows, tile) < 4:
        tile = max(_CHUNK, _round_up(tile // 2, _CHUNK))
    padded = _round_up(folded_rows, tile)
    if padded != folded_rows:                     # ragged grid only
        x_f = jnp.pad(x_f, ((0, padded - folded_rows), (0, 0)))
    grid = padded // tile

    fin, fh, fo = fold * in_dim, fold * hidden, fold * out_dim
    full = lambda shape: pl.BlockSpec(shape, lambda i: (0, 0))

    cost = pl.CostEstimate(
        flops=int(2 * padded * (fin * fh + fh * fh + fh * fo)),
        transcendentals=0,
        bytes_accessed=int(padded * fin * 4 + padded * fo * 4
                           + (W1f.size + W2f.size + W3f.size) * 2
                           + (b1f.size + b2f.size + b3f.size) * 4))

    out_f = pl.pallas_call(
        _renderer_kernel,
        out_shape=jax.ShapeDtypeStruct((padded, fo), jnp.float32),
        grid_spec=pltpu.PrefetchScalarGridSpec(
            num_scalar_prefetch=0,
            grid=(grid,),
            in_specs=[
                pl.BlockSpec((tile, fin), lambda i: (i, 0)),   # x row tile (f32)
                full((fin, fh)),                               # W1 block-diag (resident)
                full((1, fh)),                                 # b1
                full((fh, fh)),                                # W2 block-diag
                full((1, fh)),                                 # b2
                full((fh, fo)),                                # W3 staircase
                full((1, fo)),                                 # b3
            ],
            out_specs=pl.BlockSpec((tile, fo), lambda i: (i, 0)),
        ),
        compiler_params=pltpu.CompilerParams(
            dimension_semantics=("parallel",) if grid > 1 else ("arbitrary",),
            vmem_limit_bytes=vmem_limit_bytes),
        cost_estimate=cost,
    )(x_f, W1f, b1f, W2f, b2f, W3f, b3f)

    # Un-fold: (folded, fold*out_dim) -> (N, out_dim). Free reshape + slice.
    out = out_f[:folded_rows].reshape(n4, out_dim)[:n_rows]
    return out.reshape(*lead, out_dim)


def init_params(key, in_dim=32, hidden_dim=32, out_dim=1):
    """Deterministic synthetic init (PyTorch-like uniform fan-in bounds)."""
    ks = jax.random.split(key, 6)

    def lin(kw, kb, fan_in, fan_out):
        bound = 1.0 / jnp.sqrt(fan_in)
        w = jax.random.uniform(kw, (fan_in, fan_out), jnp.float32, -bound, bound)
        b = jax.random.uniform(kb, (1, fan_out), jnp.float32, -bound, bound)
        return w, b

    W1, b1 = lin(ks[0], ks[1], in_dim, hidden_dim)
    W2, b2 = lin(ks[2], ks[3], hidden_dim, hidden_dim)
    W3, b3 = lin(ks[4], ks[5], hidden_dim, out_dim)
    return dict(W1=W1, b1=b1, W2=W2, b2=b2, W3=W3, b3=b3)


def reference_forward(x, p):
    """Pure f32 reference (matches the PyTorch module)."""
    hi = jax.lax.Precision.HIGHEST
    x2 = x.reshape(-1, x.shape[-1]).astype(jnp.float32)
    h = jnp.maximum(jnp.dot(x2, p["W1"], precision=hi) + p["b1"], 0.0)
    h = jnp.maximum(jnp.dot(h, p["W2"], precision=hi) + p["b2"], 0.0)
    o = jnp.dot(h, p["W3"], precision=hi) + p["b3"]
    return o.reshape(*x.shape[:-1], o.shape[-1])


if __name__ == "__main__":
    key = jax.random.PRNGKey(0)
    k_x, k_p = jax.random.split(key)

    in_dim, hidden_dim, out_dim = 32, 32, 1
    batch, n_pts = 2, 1024          # 2048 rows -> 512 folded rows -> grid of 4

    x = jax.random.normal(k_x, (batch, n_pts, in_dim), jnp.float32)
    params = init_params(k_p, in_dim, hidden_dim, out_dim)

    fwd = jax.jit(g_renderer_forward)
    out = jax.block_until_ready(fwd(x, params))

    ref = reference_forward(x, params)
    assert out.shape == (batch, n_pts, out_dim), out.shape
    max_err = float(jnp.max(jnp.abs(out - ref)))
    # bf16 weights/activations with f32 accumulation vs pure-f32 reference.
    assert max_err < 3e-2, f"mismatch vs f32 reference, max abs err {max_err}"

    print("KERNEL_OK")
</pallas_src>

<mosaic_0001>
module attributes {stable_mosaic.version = 11 : i64} {
  func.func @_renderer_kernel(%arg0: i32, %arg1: memref<128x128xf32, #tpu.memory_space<vmem>>, %arg2: memref<128x128xbf16, #tpu.memory_space<vmem>>, %arg3: memref<1x128xf32, #tpu.memory_space<vmem>>, %arg4: memref<128x128xbf16, #tpu.memory_space<vmem>>, %arg5: memref<1x128xf32, #tpu.memory_space<vmem>>, %arg6: memref<128x4xbf16, #tpu.memory_space<vmem>>, %arg7: memref<1x4xf32, #tpu.memory_space<vmem>>, %arg8: memref<128x4xf32, #tpu.memory_space<vmem>>) attributes {dimension_semantics = [#tpu.dimension_semantics<parallel>], iteration_bounds = array<i64: 4>, scalar_prefetch = 0 : i64, scratch_operands = 0 : i64, tpu.core_type = #tpu.core_type<tc>, window_params = [{transform_indices = @transform_0, window_bounds = array<i64: 128, 128>}, {pipeline_mode = #tpu.pipeline_mode<synchronous>, transform_indices = @transform_1, window_bounds = array<i64: 128, 128>}, {pipeline_mode = #tpu.pipeline_mode<synchronous>, transform_indices = @transform_2, window_bounds = array<i64: 1, 128>}, {pipeline_mode = #tpu.pipeline_mode<synchronous>, transform_indices = @transform_3, window_bounds = array<i64: 128, 128>}, {pipeline_mode = #tpu.pipeline_mode<synchronous>, transform_indices = @transform_4, window_bounds = array<i64: 1, 128>}, {pipeline_mode = #tpu.pipeline_mode<synchronous>, transform_indices = @transform_5, window_bounds = array<i64: 128, 4>}, {pipeline_mode = #tpu.pipeline_mode<synchronous>, transform_indices = @transform_6, window_bounds = array<i64: 1, 4>}, {transform_indices = @transform_7, window_bounds = array<i64: 128, 4>}]} {
    %c0 = arith.constant 0 : index
    %c0_0 = arith.constant 0 : index
    %0 = vector.load %arg2[%c0, %c0_0] : memref<128x128xbf16, #tpu.memory_space<vmem>>, vector<128x128xbf16>
    %c0_1 = arith.constant 0 : index
    %c0_2 = arith.constant 0 : index
    %1 = vector.load %arg3[%c0_1, %c0_2] : memref<1x128xf32, #tpu.memory_space<vmem>>, vector<1x128xf32>
    %c0_3 = arith.constant 0 : index
    %c0_4 = arith.constant 0 : index
    %2 = vector.load %arg4[%c0_3, %c0_4] : memref<128x128xbf16, #tpu.memory_space<vmem>>, vector<128x128xbf16>
    %c0_5 = arith.constant 0 : index
    %c0_6 = arith.constant 0 : index
    %3 = vector.load %arg5[%c0_5, %c0_6] : memref<1x128xf32, #tpu.memory_space<vmem>>, vector<1x128xf32>
    %c0_7 = arith.constant 0 : index
    %c0_8 = arith.constant 0 : index
    %4 = vector.load %arg6[%c0_7, %c0_8] : memref<128x4xbf16, #tpu.memory_space<vmem>>, vector<128x4xbf16>
    %c0_9 = arith.constant 0 : index
    %c0_10 = arith.constant 0 : index
    %5 = vector.load %arg7[%c0_9, %c0_10] : memref<1x4xf32, #tpu.memory_space<vmem>>, vector<1x4xf32>
    %c0_i32 = arith.constant 0 : i32
    %c128_i32 = arith.constant 128 : i32
    %6 = arith.muli %c0_i32, %c128_i32 : i32
    %7 = tpu.assume_multiple %6, 128 : i32
    %8 = arith.index_cast %7 : i32 to index
    %c0_11 = arith.constant 0 : index
    %9 = vector.load %arg1[%8, %c0_11] : memref<128x128xf32, #tpu.memory_space<vmem>>, vector<128x128xf32>
    %10 = arith.truncf %9 : vector<128x128xf32> to vector<128x128xbf16>
    %cst = arith.constant dense<0.000000e+00> : vector<128x128xf32>
    %11 = tpu.matmul %10, %0, %cst {dimension_numbers = #tpu.dot_dimension_numbers<[1], [0], [0], [1], [0, 0, 1, 1], [], []>} : vector<128x128xbf16>, vector<128x128xbf16>, vector<128x128xf32> -> vector<128x128xf32>
    %12 = vector.broadcast %1 : vector<1x128xf32> to vector<128x128xf32>
    %13 = arith.addf %11, %12 : vector<128x128xf32>
    %cst_12 = arith.constant 0.000000e+00 : f32
    %14 = vector.broadcast %cst_12 : f32 to vector<128x128xf32>
    %15 = arith.maximumf %13, %14 : vector<128x128xf32>
    %16 = arith.truncf %15 : vector<128x128xf32> to vector<128x128xbf16>
    %cst_13 = arith.constant dense<0.000000e+00> : vector<128x128xf32>
    %17 = tpu.matmul %16, %2, %cst_13 {dimension_numbers = #tpu.dot_dimension_numbers<[1], [0], [0], [1], [0, 0, 1, 1], [], []>} : vector<128x128xbf16>, vector<128x128xbf16>, vector<128x128xf32> -> vector<128x128xf32>
    %18 = vector.broadcast %3 : vector<1x128xf32> to vector<128x128xf32>
    %19 = arith.addf %17, %18 : vector<128x128xf32>
    %cst_14 = arith.constant 0.000000e+00 : f32
    %20 = vector.broadcast %cst_14 : f32 to vector<128x128xf32>
    %21 = arith.maximumf %19, %20 : vector<128x128xf32>
    %22 = arith.truncf %21 : vector<128x128xf32> to vector<128x128xbf16>
    %cst_15 = arith.constant dense<0.000000e+00> : vector<128x4xf32>
    %23 = tpu.matmul %22, %4, %cst_15 {dimension_numbers = #tpu.dot_dimension_numbers<[1], [0], [0], [1], [0, 0, 1, 1], [], []>} : vector<128x128xbf16>, vector<128x4xbf16>, vector<128x4xf32> -> vector<128x4xf32>
    %24 = vector.broadcast %5 : vector<1x4xf32> to vector<128x4xf32>
    %25 = arith.addf %23, %24 : vector<128x4xf32>
    %26 = arith.index_cast %7 : i32 to index
    %c0_16 = arith.constant 0 : index
    %27 = vector.load %arg8[%26, %c0_16] : memref<128x4xf32, #tpu.memory_space<vmem>>, vector<128x4xf32>
    tpu.vector_store %arg8[%26, %c0_16], %25 {strides = array<i32>} : memref<128x4xf32, #tpu.memory_space<vmem>>, vector<128x4xf32>,
    %c1_i32 = arith.constant 1 : i32
    return
  }
  func.func @transform_0(%arg0: i32) -> (i32, i32) {
    %c0_i32 = arith.constant 0 : i32
    %c0_i32_0 = arith.constant 0 : i32
    return %arg0, %c0_i32 : i32, i32
  }
  func.func @transform_1(%arg0: i32) -> (i32, i32) {
    %c0_i32 = arith.constant 0 : i32
    %c0_i32_0 = arith.constant 0 : i32
    %c0_i32_1 = arith.constant 0 : i32
    return %c0_i32, %c0_i32_0 : i32, i32
  }
  func.func @transform_2(%arg0: i32) -> (i32, i32) {
    %c0_i32 = arith.constant 0 : i32
    %c0_i32_0 = arith.constant 0 : i32
    %c0_i32_1 = arith.constant 0 : i32
    return %c0_i32, %c0_i32_0 : i32, i32
  }
  func.func @transform_3(%arg0: i32) -> (i32, i32) {
    %c0_i32 = arith.constant 0 : i32
    %c0_i32_0 = arith.constant 0 : i32
    %c0_i32_1 = arith.constant 0 : i32
    return %c0_i32, %c0_i32_0 : i32, i32
  }
  func.func @transform_4(%arg0: i32) -> (i32, i32) {
    %c0_i32 = arith.constant 0 : i32
    %c0_i32_0 = arith.constant 0 : i32
    %c0_i32_1 = arith.constant 0 : i32
    return %c0_i32, %c0_i32_0 : i32, i32
  }
  func.func @transform_5(%arg0: i32) -> (i32, i32) {
    %c0_i32 = arith.constant 0 : i32
    %c0_i32_0 = arith.constant 0 : i32
    %c0_i32_1 = arith.constant 0 : i32
    return %c0_i32, %c0_i32_0 : i32, i32
  }
  func.func @transform_6(%arg0: i32) -> (i32, i32) {
    %c0_i32 = arith.constant 0 : i32
    %c0_i32_0 = arith.constant 0 : i32
    %c0_i32_1 = arith.constant 0 : i32
    return %c0_i32, %c0_i32_0 : i32, i32
  }
  func.func @transform_7(%arg0: i32) -> (i32, i32) {
    %c0_i32 = arith.constant 0 : i32
    %c0_i32_0 = arith.constant 0 : i32
    return %arg0, %c0_i32 : i32, i32
  }
}

</mosaic_0001>

<bundles_post_ra>
// kernel: g_renderer_forward.1
= control target key start
LH: loop header
LB: loop body
LE: loop exit
PB: predicated region body
PF: predicated region fallthrough
CT: control target
= control target key end

     0   :  { %s1210_s24 = smov 0   ;;  %s1403_s0 = inlined_call_operand.vmem [shape: f32[512,128], index: 0, kind: input, shape index: {}]   ;;  %s1404_s1 = inlined_call_operand.vmem [shape: bf16[128,128], index: 1, kind: input, shape index: {}]   ;;  %s1405_s2 = inlined_call_operand.vmem [shape: f32[1,128], index: 2, kind: input, shape index: {}]   ;;  %s1406_s3 = inlined_call_operand.vmem [shape: bf16[128,128], index: 3, kind: input, shape index: {}]   ;;  %s1407_s4 = inlined_call_operand.vmem [shape: f32[1,128], index: 4, kind: input, shape index: {}]   ;;  %s1408_s5 = inlined_call_operand.vmem [shape: bf16[128,4], index: 5, kind: input, shape index: {}]   ;;  %s1409_s6 = inlined_call_operand.vmem [shape: f32[1,4], index: 6, kind: input, shape index: {}]   ;;  %s1410_s7 = inlined_call_operand.vmem [shape: f32[512,4], index: 7, kind: output, shape index: {}]  }
   0x1 LB: > { %s932_s25 = sadd.s32 4294967295, %s1168_s24   ;;  %p936_p0 = scmp.ge.s32.totalorder %s1168_s24, 1  ;;  %s1168_s24 = sphi %s1210_s24, %s17_s24  }
   0x2   : > { %p238_p1 = scmp.lt.s32.totalorder %s1168_s24, 5 }
   0x4   : > { %p239_p2 = pnand %p936_p0, %p238_p1 }
   0x5   : > { %v1138_v0 = vld [vmem:[%s1404_s1] sm:$0xff] (!%p239_p2)   ;;  %s937_s28 = sshll.u32 (!%p239_p2), %s932_s25, 4  ;;  %v1139_v1 = vld [vmem:[%s1404_s1 + $0x8] sm:$0xff] (!%p239_p2)   ;;  %v1140_v2 = vld [vmem:[%s1404_s1 + $0x10] sm:$0xff] (!%p239_p2)   ;;  %vm859_vm0 = vcmask (!%p239_p2), 31744  }
   0x6   : > { %242 = sbr.rel (%p239_p2) target bundleno = 724 (0x2d4), region = 48  ;;  %p271_p3 = scmp.lt.s32.totalorder (!%p239_p2), %s937_s28, 63  ;;  %1018 = vmatprep.subr.bf16.mxu0 (!%p239_p2), %v1138_v0  ;;  %v1141_v3 = vld [vmem:[%s1404_s1 + $0x18] sm:$0xff] (!%p239_p2)   ;;  %v1142_v7 = vld [vmem:[%s1404_s1 + $0x20] sm:$0xff] (!%p239_p2)   ;;  %v1147_v9 = vld [vmem:[%s1406_s3 + $0x8] sm:$0xff] (!%p239_p2)  }
   0x7   : > { %1019 = vmatpush3.bf16.msra.mxu0 (!%p239_p2), %v1138_v0  ;;  %v1146_v8 = vld [vmem:[%s1406_s3] sm:$0xff] (!%p239_p2)   ;;  %v1143_v10 = vld [vmem:[%s1404_s1 + $0x28] sm:$0xff] (!%p239_p2)   ;;  %v1148_v11 = vld [vmem:[%s1406_s3 + $0x10] sm:$0xff] (!%p239_p2)  }
   0x8   : > { %1020 = vmatprep.subr.bf16.mxu0 (!%p239_p2), %v1139_v1  ;;  %1050 = vmatprep.subr.bf16.mxu1 (!%p239_p2), %v1146_v8  ;;  %v1144_v12 = vld [vmem:[%s1404_s1 + $0x30] sm:$0xff] (!%p239_p2)   ;;  %v1149_v13 = vld [vmem:[%s1406_s3 + $0x18] sm:$0xff] (!%p239_p2)   ;;  %v1150_v15 = vld [vmem:[%s1406_s3 + $0x20] sm:$0xff] (!%p239_p2)  }
   0x9   : > { %1051 = vmatpush3.bf16.msra.mxu1 (!%p239_p2), %v1146_v8  ;;  %v1145_v14 = vld [vmem:[%s1404_s1 + $0x38] sm:$0xff] (!%p239_p2)   ;;  %v1151_v21 = vld [vmem:[%s1406_s3 + $0x28] sm:$0xff] (!%p239_p2)   ;;  %v1152_v38 = vld [vmem:[%s1406_s3 + $0x30] sm:$0xff] (!%p239_p2)  }
   0xa   : > { %1052 = vmatprep.subr.bf16.mxu1 (!%p239_p2), %v1147_v9  ;;  %v1153_v39 = vld [vmem:[%s1406_s3 + $0x38] sm:$0xff] (!%p239_p2)   ;;  %v1154_v40 = vld [vmem:[%s1408_s5] sm:$0xff] (!%p239_p2)   ;;  %v1155_v41 = vld [vmem:[%s1408_s5 + $0x8] sm:$0xff] (!%p239_p2)  }
   0xb   : > { %1021 = vmatpush3.bf16.msra.mxu0 (!%p239_p2), %v1139_v1  ;;  %v1156_v42 = vld [vmem:[%s1408_s5 + $0x10] sm:$0xff] (!%p239_p2)   ;;  %v1304_v43 = vld [vmem:[%s1408_s5 + $0x18] sm:$0xff] (!%p239_p2)   ;;  %v1310_v44 = vld [vmem:[%s1408_s5 + $0x20] sm:$0xff] (!%p239_p2)  }
   0xc   : > { %1022 = vmatprep.subr.bf16.mxu0 (!%p239_p2), %v1140_v2  ;;  %v1317_v45 = vld [vmem:[%s1408_s5 + $0x28] sm:$0xff] (!%p239_p2)   ;;  %v1325_v46 = vld [vmem:[%s1405_s2] ss:$0 sm:$0xff] (!%p239_p2) }
   0xd   : > { %s1412_s28 = smov (!%p271_p3, %s937_s28), 63  ;;  %1053 = vmatpush3.bf16.msra.mxu1 %v1147_v9 }
   0xe   : > { %s938_s10 = sshll.u32 %s1412_s28, 3  ;;  %1054 = vmatprep.subr.bf16.mxu1 %v1148_v11 }
   0xf   : > { %s1235_s13 = scalar_lea.vmem %s1403_s0, %s938_s10  ;;  %1023 = vmatpush3.bf16.msra.mxu0 %v1140_v2  ;;  %s1366_s25 = scalar_lea.vmem %s1410_s7, %s938_s10 }
  0x10   : > { %v334_v4 = vld [vmem:[%s1235_s13] sm:$0xff]  ;;  %v335_v5 = vld [vmem:[%s1235_s13 + $0x8] sm:$0xff]  ;;  %1024 = vmatprep.subr.bf16.mxu0 %v1141_v3  ;;  %v336_v16 = vld [vmem:[%s1235_s13 + $0x10] sm:$0xff] }
  0x11   : > { %v350_v6 = vpack.c.bf16 %v335_v5, %v334_v4  ;;  %1055 = vmatpush3.bf16.msra.mxu1 %v1148_v11  ;;  %v337_v17 = vld [vmem:[%s1235_s13 + $0x18] sm:$0xff]  ;;  %v338_v18 = vld [vmem:[%s1235_s13 + $0x20] sm:$0xff]  ;;  %v339_v19 = vld [vmem:[%s1235_s13 + $0x28] sm:$0xff] }
  0x12   : > { %1056 = vmatprep.subr.bf16.mxu1 %v1149_v13  ;;  %v351_v20 = vpack.c.bf16 %v337_v17, %v336_v16  ;;  %v352_v22 = vpack.c.bf16 %v339_v19, %v338_v18  ;;  %v340_v23 = vld [vmem:[%s1235_s13 + $0x30] sm:$0xff]  ;;  %v341_v24 = vld [vmem:[%s1235_s13 + $0x38] sm:$0xff]  ;;  %v342_v25 = vld [vmem:[%s1235_s13 + $0x40] sm:$0xff] }
  0x13   : > { %1034 = vmatprep.mubr.bf16.mxu0 %v350_v6  ;;  %1025 = vmatpush3.bf16.msra.mxu0 %v1141_v3  ;;  %v343_v26 = vld [vmem:[%s1235_s13 + $0x48] sm:$0xff]  ;;  %v353_v27 = vpack.c.bf16 %v341_v24, %v340_v23  ;;  %v344_v29 = vld [vmem:[%s1235_s13 + $0x50] sm:$0xff]  ;;  %v345_v30 = vld [vmem:[%s1235_s13 + $0x58] sm:$0xff] }
  0x14   : > { %1026 = vmatprep.subr.bf16.mxu0 %v1142_v7  ;;  %v354_v28 = vpack.c.bf16 %v343_v26, %v342_v25  ;;  %v346_v31 = vld [vmem:[%s1235_s13 + $0x60] sm:$0xff]  ;;  %v347_v32 = vld [vmem:[%s1235_s13 + $0x68] sm:$0xff]  ;;  %v355_v33 = vpack.c.bf16 %v345_v30, %v344_v29  ;;  %v348_v35 = vld [vmem:[%s1235_s13 + $0x70] sm:$0xff] }
  0x15   : > { %1057 = vmatpush3.bf16.msra.mxu1 %v1149_v13  ;;  %v356_v34 = vpack.c.bf16 %v347_v32, %v346_v31  ;;  %v349_v36 = vld [vmem:[%s1235_s13 + $0x78] sm:$0xff] }
  0x16   : > { %1058 = vmatprep.subr.bf16.mxu1 %v1150_v15  ;;  %v357_v37 = vpack.c.bf16 %v349_v36, %v348_v35 }
  0x17   : > { %1027 = vmatpush3.bf16.msra.mxu0 %v1142_v7 }
  0x18   : > { %1028 = vmatprep.subr.bf16.mxu0 %v1143_v10 }
  0x19   : > { %1059 = vmatpush3.bf16.msra.mxu1 %v1150_v15 }
  0x1a   : > { %1060 = vmatprep.subr.bf16.mxu1 %v1151_v21 }
  0x1b   : > { %1029 = vmatpush3.bf16.msra.mxu0 %v1143_v10 }
  0x1c   : > { %1030 = vmatprep.subr.bf16.mxu0 %v1144_v12 }
  0x1d   : > { %1061 = vmatpush3.bf16.msra.mxu1 %v1151_v21 }
  0x1e   : > { %1062 = vmatprep.subr.bf16.mxu1 %v1152_v38 }
  0x1f   : > { %1031 = vmatpush3.bf16.msra.mxu0 %v1144_v12 }
  0x20   : > { %1032 = vmatprep.subr.bf16.mxu0 %v1145_v14 }
  0x21   : > { %1063 = vmatpush3.bf16.msra.mxu1 %v1152_v38 }
  0x22   : > { %1064 = vmatprep.subr.bf16.mxu1 %v1153_v39 }
  0x23   : > { %1033 = vmatpush3.bf16.msra.mxu0 %v1145_v14 }
  0x24   : > { %1082 = vmatprep.subr.bf16.mxu0 %v1154_v40 }
  0x25   : > { %1065 = vmatpush3.bf16.msra.mxu1 %v1153_v39  ;;  %v1160_v39 = vld [vmem:[%s1408_s5 + $0x30] sm:$0xff]  }
  0x26   : > { %1035 = vmatmul.mubr.bf16.vlgmr.msra.gmra.mrb[0].mxu0 %v351_v20  ;;  %1114 = vmatprep.subr.bf16.mxu1 %v1154_v40 }
  0x27   : > { %1038 = vmatprep.mubr.bf16.mxu0 %v352_v22  ;;  %1083 = vmatpush3.bf16.msra.mxu0 %v1154_v40 }
  0x28   : > { %1084 = vmatprep.subr.bf16.mxu0 %v1155_v41 }
  0x2b   : > { %1085 = vmatpush3.bf16.msra.mxu0 %v1155_v41 }
  0x2c   : > { %1086 = vmatprep.subr.bf16.mxu0 %v1156_v42 }
  0x2e   : > { %1039 = vmatmul.mubr.bf16.gmra.mrb[4].mxu0 %v353_v27 }
  0x2f   : > { %1042 = vmatprep.mubr.bf16.mxu0 %v354_v28  ;;  %1087 = vmatpush3.bf16.msra.mxu0 %v1156_v42 }
  0x30   : > { %1088 = vmatprep.subr.bf16.mxu0 %v1304_v43 }
  0x33   : > { %1089 = vmatpush3.bf16.msra.mxu0 %v1304_v43 }
  0x34   : > { %1090 = vmatprep.subr.bf16.mxu0 %v1310_v44 }
  0x36   : > { %1043 = vmatmul.mubr.bf16.gmra.mrb[8].mxu0 %v355_v33 }
  0x37   : > { %1046 = vmatprep.mubr.bf16.mxu0 %v356_v34  ;;  %1091 = vmatpush3.bf16.msra.mxu0 %v1310_v44 }
  0x38   : > { %1092 = vmatprep.subr.bf16.mxu0 %v1317_v45 }
  0x3b   : > { %1093 = vmatpush3.bf16.msra.mxu0 %v1317_v45 }
  0x3c   : > { %1094 = vmatprep.subr.bf16.mxu0 %v1160_v39 }
  0x3e   : > { %1047 = vmatmul.mubr.bf16.gmra.mrb[12].mxu0 %v357_v37 }
  0x3f   : > { %1095 = vmatpush3.bf16.msra.mxu0 %v1160_v39 }
  0xf9   : > { %v1036_v47 = vpop.f32.mrb[0].mxu0 }
  0xfa   : > { %v455_v48 = vadd.f32 %v1036_v47, %v1325_v46  ;;  %v446_v49 = vpop.f32.mrb[1].mxu0 }
  0xfb   : > { %v447_v50 = vadd.f32 %v1325_v46, %v446_v49  ;;  %v1037_v51 = vpop.f32.mrb[2].mxu0 }
  0xfc   : > { %v458_v52 = vadd.f32 %v1037_v51, %v1325_v46  ;;  %v449_v53 = vpop.f32.mrb[3].mxu0  ;;  %v511_v55 = vmax.f32 %v455_v48, 0.0 }
  0xfd   : > { %v450_v54 = vadd.f32 %v1325_v46, %v449_v53  ;;  %v509_v57 = vmax.f32 %v447_v50, 0.0 }
  0xfe   : > { %v512_v56 = vmax.f32 %v458_v52, 0.0 }
  0xff   : > { %v510_v58 = vmax.f32 %v450_v54, 0.0 }
 0x100   : > { %v526_v59 = vpack.c.bf16 %v512_v56, %v511_v55 }
 0x101   : > { %v1040_v60 = vpop.f32.mrb[4].mxu0  ;;  %v525_v61 = vpack.c.bf16 %v510_v58, %v509_v57 }
 0x102   : > { %v471_v62 = vadd.f32 %v1040_v60, %v1325_v46  ;;  %v462_v63 = vpop.f32.mrb[5].mxu0 }
 0x103   : > { %v463_v0 = vadd.f32 %v1325_v46, %v462_v63  ;;  %v1041_v1 = vpop.f32.mrb[6].mxu0  ;;  %1066 = vmatprep.mubr.bf16.mxu1 %v525_v61 }
 0x104   : > { %v474_v2 = vadd.f32 %v1041_v1, %v1325_v46  ;;  %v465_v3 = vpop.f32.mrb[7].mxu0  ;;  %1067 = vmatmul.mubr.bf16.vlgmr.msra.gmra.mrb[0].mxu1 %v526_v59  ;;  %v515_v5 = vmax.f32 %v471_v62, 0.0 }
 0x105   : > { %v466_v4 = vadd.f32 %v1325_v46, %v465_v3  ;;  %1122 = vmatpush3.bf16.msra.mxu1 %v1154_v40  ;;  %v513_v7 = vmax.f32 %v463_v0, 0.0  ;;  %v1161_v40 = vld [vmem:[%s1408_s5 + $0x38] sm:$0xff]  }
 0x106   : > { %v516_v6 = vmax.f32 %v474_v2, 0.0  ;;  %1115 = vmatprep.subr.bf16.mxu1 %v1155_v41  ;;  %1096 = vmatprep.subr.bf16.mxu0 %v1161_v40 }
 0x107   : > { %v514_v8 = vmax.f32 %v466_v4, 0.0  ;;  %1097 = vmatpush3.bf16.msra.mxu0 %v1161_v40 }
 0x108   : > { %v528_v9 = vpack.c.bf16 %v516_v6, %v515_v5 }
 0x109   : > { %v527_v10 = vpack.c.bf16 %v514_v8, %v513_v7  ;;  %v1044_v11 = vpop.f32.mrb[8].mxu0  ;;  %1123 = vmatpush3.bf16.msra.mxu1 %v1155_v41  ;;  %v950_v41 = vld [vmem:[%s1407_s4] ss:$0 sm:$0xff] }
 0x10a   : > { %v487_v12 = vadd.f32 %v1044_v11, %v1325_v46  ;;  %v478_v13 = vpop.f32.mrb[9].mxu0  ;;  %1116 = vmatprep.subr.bf16.mxu1 %v1156_v42 }
 0x10b   : > { %v479_v14 = vadd.f32 %v1325_v46, %v478_v13  ;;  %v1045_v15 = vpop.f32.mrb[10].mxu0  ;;  %1070 = vmatprep.mubr.bf16.mxu1 %v527_v10 }
 0x10c   : > { %v490_v16 = vadd.f32 %v1045_v15, %v1325_v46  ;;  %v481_v17 = vpop.f32.mrb[11].mxu0  ;;  %1071 = vmatmul.mubr.bf16.gmra.mrb[4].mxu1 %v528_v9  ;;  %v519_v19 = vmax.f32 %v487_v12, 0.0 }
 0x10d   : > { %v482_v18 = vadd.f32 %v1325_v46, %v481_v17  ;;  %1124 = vmatpush3.bf16.msra.mxu1 %v1156_v42  ;;  %v517_v21 = vmax.f32 %v479_v14, 0.0 }
 0x10e   : > { %v520_v20 = vmax.f32 %v490_v16, 0.0  ;;  %1117 = vmatprep.subr.bf16.mxu1 %v1304_v43 }
 0x10f   : > { %v518_v22 = vmax.f32 %v482_v18, 0.0 }
 0x110   : > { %v530_v23 = vpack.c.bf16 %v520_v20, %v519_v19 }
 0x111   : > { %v529_v24 = vpack.c.bf16 %v518_v22, %v517_v21  ;;  %v1048_v25 = vpop.f32.mrb[12].mxu0  ;;  %1125 = vmatpush3.bf16.msra.mxu1 %v1304_v43 }
 0x112   : > { %v503_v26 = vadd.f32 %v1048_v25, %v1325_v46  ;;  %v494_v27 = vpop.f32.mrb[13].mxu0  ;;  %1118 = vmatprep.subr.bf16.mxu1 %v1310_v44 }
 0x113   : > { %v495_v28 = vadd.f32 %v1325_v46, %v494_v27  ;;  %v1049_v29 = vpop.f32.mrb[14].mxu0  ;;  %1074 = vmatprep.mubr.bf16.mxu1 %v529_v24 }
 0x114   : > { %v506_v30 = vadd.f32 %v1049_v29, %v1325_v46  ;;  %v497_v31 = vpop.f32.mrb[15].mxu0  ;;  %1075 = vmatmul.mubr.bf16.gmra.mrb[8].mxu1 %v530_v23  ;;  %v523_v33 = vmax.f32 %v503_v26, 0.0 }
 0x115   : > { %v498_v32 = vadd.f32 %v1325_v46, %v497_v31  ;;  %1126 = vmatpush3.bf16.msra.mxu1 %v1310_v44  ;;  %v521_v35 = vmax.f32 %v495_v28, 0.0 }
 0x116   : > { %v524_v34 = vmax.f32 %v506_v30, 0.0  ;;  %1119 = vmatprep.subr.bf16.mxu1 %v1317_v45 }
 0x117   : > { %v522_v36 = vmax.f32 %v498_v32, 0.0 }
 0x118   : > { %v532_v37 = vpack.c.bf16 %v524_v34, %v523_v33  ;;  %v959_v34 = vld [vmem:[%s1409_s6] ss:$0 sm:$0xff] }
 0x119   : > { %v531_v38 = vpack.c.bf16 %v522_v36, %v521_v35  ;;  %1127 = vmatpush3.bf16.msra.mxu1 %v1317_v45 }
 0x11a   : > { %1120 = vmatprep.subr.bf16.mxu1 %v1160_v39 }
 0x11b   : > { %1078 = vmatprep.mubr.bf16.mxu1 %v531_v38 }
 0x11c   : > { %1079 = vmatmul.mubr.bf16.gmra.mrb[12].mxu1 %v532_v37 }
 0x11d   : > { %1128 = vmatpush3.bf16.msra.mxu1 %v1160_v39 }
 0x11e   : > { %1121 = vmatprep.subr.bf16.mxu1 %v1161_v40 }
 0x121   : > { %1129 = vmatpush3.bf16.msra.mxu1 %v1161_v40 }
 0x1d7   : > { %v1068_v42 = vpop.f32.mrb[0].mxu1 }
 0x1d8   : > { %v630_v43 = vadd.f32 %v1068_v42, %v950_v41  ;;  %v621_v44 = vpop.f32.mrb[1].mxu1 }
 0x1d9   : > { %v622_v45 = vadd.f32 %v950_v41, %v621_v44  ;;  %v1069_v46 = vpop.f32.mrb[2].mxu1 }
 0x1da   : > { %v633_v47 = vadd.f32 %v1069_v46, %v950_v41  ;;  %v624_v48 = vpop.f32.mrb[3].mxu1  ;;  %v686_v50 = vmax.f32 %v630_v43, 0.0 }
 0x1db   : > { %v625_v49 = vadd.f32 %v950_v41, %v624_v48  ;;  %v684_v52 = vmax.f32 %v622_v45, 0.0 }
 0x1dc   : > { %v687_v51 = vmax.f32 %v633_v47, 0.0 }
 0x1dd   : > { %v685_v53 = vmax.f32 %v625_v49, 0.0 }
 0x1de   : > { %v701_v54 = vpack.c.bf16 %v687_v51, %v686_v50 }
 0x1df   : > { %v700_v55 = vpack.c.bf16 %v685_v53, %v684_v52  ;;  %v1072_v56 = vpop.f32.mrb[4].mxu1 }
 0x1e0   : > { %v646_v57 = vadd.f32 %v1072_v56, %v950_v41  ;;  %v637_v58 = vpop.f32.mrb[5].mxu1 }
 0x1e1   : > { %v638_v59 = vadd.f32 %v950_v41, %v637_v58  ;;  %v1073_v60 = vpop.f32.mrb[6].mxu1  ;;  %1098 = vmatprep.mubr.bf16.mxu0 %v700_v55 }
 0x1e2   : > { %v649_v61 = vadd.f32 %v1073_v60, %v950_v41  ;;  %v640_v62 = vpop.f32.mrb[7].mxu1  ;;  %1099 = vmatmul.mubr.bf16.vlgmr.msra.gmra.mrb[16].mxu0 %v701_v54  ;;  %v690_v0 = vmax.f32 %v646_v57, 0.0 }
 0x1e3   : > { %v641_v63 = vadd.f32 %v950_v41, %v640_v62  ;;  %v688_v2 = vmax.f32 %v638_v59, 0.0 }
 0x1e4   : > { %v691_v1 = vmax.f32 %v649_v61, 0.0 }
 0x1e5   : > { %v689_v3 = vmax.f32 %v641_v63, 0.0 }
 0x1e6   : > { %v703_v4 = vpack.c.bf16 %v691_v1, %v690_v0 }
 0x1e7   : > { %v702_v5 = vpack.c.bf16 %v689_v3, %v688_v2  ;;  %v1076_v6 = vpop.f32.mrb[8].mxu1 }
 0x1e8   : > { %v662_v7 = vadd.f32 %v1076_v6, %v950_v41  ;;  %v653_v8 = vpop.f32.mrb[9].mxu1 }
 0x1e9   : > { %v654_v9 = vadd.f32 %v950_v41, %v653_v8  ;;  %v1077_v10 = vpop.f32.mrb[10].mxu1  ;;  %1102 = vmatprep.mubr.bf16.mxu0 %v702_v5 }
 0x1ea   : > { %v665_v11 = vadd.f32 %v1077_v10, %v950_v41  ;;  %v656_v12 = vpop.f32.mrb[11].mxu1  ;;  %1103 = vmatmul.mubr.bf16.gmra.mrb[20].mxu0 %v703_v4  ;;  %v694_v14 = vmax.f32 %v662_v7, 0.0 }
 0x1eb   : > { %v657_v13 = vadd.f32 %v950_v41, %v656_v12  ;;  %v692_v16 = vmax.f32 %v654_v9, 0.0 }
 0x1ec   : > { %v695_v15 = vmax.f32 %v665_v11, 0.0 }
 0x1ed   : > { %v693_v17 = vmax.f32 %v657_v13, 0.0 }
 0x1ee   : > { %v705_v18 = vpack.c.bf16 %v695_v15, %v694_v14 }
 0x1ef   : > { %v704_v19 = vpack.c.bf16 %v693_v17, %v692_v16  ;;  %v1080_v20 = vpop.f32.mrb[12].mxu1 }
 0x1f0   : > { %v678_v21 = vadd.f32 %v1080_v20, %v950_v41  ;;  %v669_v22 = vpop.f32.mrb[13].mxu1 }
 0x1f1   : > { %v670_v23 = vadd.f32 %v950_v41, %v669_v22  ;;  %v1081_v24 = vpop.f32.mrb[14].mxu1  ;;  %1106 = vmatprep.mubr.bf16.mxu1 %v704_v19 }
 0x1f2   : > { %v681_v25 = vadd.f32 %v1081_v24, %v950_v41  ;;  %v672_v26 = vpop.f32.mrb[15].mxu1  ;;  %1107 = vmatmul.mubr.bf16.vlgmr.msra.gmra.mrb[16].mxu1 %v705_v18  ;;  %v698_v28 = vmax.f32 %v678_v21, 0.0 }
 0x1f3   : > { %v673_v27 = vadd.f32 %v950_v41, %v672_v26  ;;  %v696_v30 = vmax.f32 %v670_v23, 0.0 }
 0x1f4   : > { %v699_v29 = vmax.f32 %v681_v25, 0.0 }
 0x1f5   : > { %v697_v31 = vmax.f32 %v673_v27, 0.0 }
 0x1f6   : > { %v707_v32 = vpack.c.bf16 %v699_v29, %v698_v28 }
 0x1f7   : > { %v706_v33 = vpack.c.bf16 %v697_v31, %v696_v30 }
 0x1f9   : > { %1110 = vmatprep.mubr.bf16.mxu1 %v706_v33 }
 0x1fa   : > { %1111 = vmatmul.mubr.bf16.gmra.mrb[20].mxu1 %v707_v32 }
 0x2b5   : > { %v1100_v35 = vpop.f32.mrb[16].mxu0 }
 0x2b6   : > { %v805_v36 = vadd.f32 %v1100_v35, %v959_v34  ;;  %v796_v37 = vpop.f32.mrb[17].mxu0 }
 0x2b7   : > { %v797_v38 = vadd.f32 %v959_v34, %v796_v37  ;;  %v1101_v39 = vpop.f32.mrb[18].mxu0 }
 0x2b8   : > { %862 = vst.msk [vmem:[%s1366_s25 + $0x10] sm:$0xff] %vm859_vm0, %v805_v36  ;;  %v808_v40 = vadd.f32 %v1101_v39, %v959_v34  ;;  %v799_v41 = vpop.f32.mrb[19].mxu0 }
 0x2b9   : > { %860 = vst.msk [vmem:[%s1366_s25] sm:$0xff] %vm859_vm0, %v797_v38  ;;  %v800_v42 = vadd.f32 %v959_v34, %v799_v41 }
 0x2ba   : > { %863 = vst.msk [vmem:[%s1366_s25 + $0x18] sm:$0xff] %vm859_vm0, %v808_v40 }
 0x2bb   : > { %861 = vst.msk [vmem:[%s1366_s25 + $0x8] sm:$0xff] %vm859_vm0, %v800_v42 }
 0x2bd   : > { %v1104_v43 = vpop.f32.mrb[20].mxu0 }
 0x2be   : > { %v821_v44 = vadd.f32 %v1104_v43, %v959_v34  ;;  %v812_v45 = vpop.f32.mrb[21].mxu0 }
 0x2bf   : > { %v813_v46 = vadd.f32 %v959_v34, %v812_v45  ;;  %v1105_v47 = vpop.f32.mrb[22].mxu0 }
 0x2c0   : > { %866 = vst.msk [vmem:[%s1366_s25 + $0x30] sm:$0xff] %vm859_vm0, %v821_v44  ;;  %v824_v48 = vadd.f32 %v1105_v47, %v959_v34  ;;  %v815_v49 = vpop.f32.mrb[23].mxu0 }
 0x2c1   : > { %864 = vst.msk [vmem:[%s1366_s25 + $0x20] sm:$0xff] %vm859_vm0, %v813_v46  ;;  %v816_v50 = vadd.f32 %v959_v34, %v815_v49 }
 0x2c2   : > { %867 = vst.msk [vmem:[%s1366_s25 + $0x38] sm:$0xff] %vm859_vm0, %v824_v48 }
 0x2c3   : > { %865 = vst.msk [vmem:[%s1366_s25 + $0x28] sm:$0xff] %vm859_vm0, %v816_v50 }
 0x2c5   : > { %v1108_v51 = vpop.f32.mrb[16].mxu1 }
 0x2c6   : > { %v837_v52 = vadd.f32 %v1108_v51, %v959_v34  ;;  %v828_v53 = vpop.f32.mrb[17].mxu1 }
 0x2c7   : > { %v829_v54 = vadd.f32 %v959_v34, %v828_v53  ;;  %v1109_v55 = vpop.f32.mrb[18].mxu1 }
 0x2c8   : > { %870 = vst.msk [vmem:[%s1366_s25 + $0x50] sm:$0xff] %vm859_vm0, %v837_v52  ;;  %v840_v56 = vadd.f32 %v1109_v55, %v959_v34  ;;  %v831_v57 = vpop.f32.mrb[19].mxu1 }
 0x2c9   : > { %868 = vst.msk [vmem:[%s1366_s25 + $0x40] sm:$0xff] %vm859_vm0, %v829_v54  ;;  %v832_v58 = vadd.f32 %v959_v34, %v831_v57 }
 0x2ca   : > { %871 = vst.msk [vmem:[%s1366_s25 + $0x58] sm:$0xff] %vm859_vm0, %v840_v56 }
 0x2cb   : > { %869 = vst.msk [vmem:[%s1366_s25 + $0x48] sm:$0xff] %vm859_vm0, %v832_v58 }
 0x2cd   : > { %v1112_v59 = vpop.f32.mrb[20].mxu1 }
 0x2ce   : > { %v853_v60 = vadd.f32 %v1112_v59, %v959_v34  ;;  %v844_v61 = vpop.f32.mrb[21].mxu1 }
 0x2cf   : > { %v845_v62 = vadd.f32 %v959_v34, %v844_v61  ;;  %v1113_v63 = vpop.f32.mrb[22].mxu1 }
 0x2d0   : > { %874 = vst.msk [vmem:[%s1366_s25 + $0x70] sm:$0xff] %vm859_vm0, %v853_v60  ;;  %v856_v0 = vadd.f32 %v1113_v63, %v959_v34  ;;  %v847_v1 = vpop.f32.mrb[23].mxu1 }
 0x2d1   : > { %872 = vst.msk [vmem:[%s1366_s25 + $0x60] sm:$0xff] %vm859_vm0, %v845_v62  ;;  %v848_v2 = vadd.f32 %v959_v34, %v847_v1 }
 0x2d2   : > { %875 = vst.msk [vmem:[%s1366_s25 + $0x78] sm:$0xff] %vm859_vm0, %v856_v0 }
 0x2d3   : > { %873 = vst.msk [vmem:[%s1366_s25 + $0x68] sm:$0xff] %vm859_vm0, %v848_v2 }
 0x2d4 PF: > { %s17_s24 = sadd.s32 1, %s1168_s24  }
 0x2d5   : > { %p14_p4 = scmp.ge.s32.totalorder %s17_s24, 6  }
 0x2d7   :  { %16 = sbr.rel (!%p14_p4) target bundleno = 1 (0x1), region = 78 }

</bundles_post_ra>
